<compile_context>
chip_gen: v7x
topology: tpu7x:2x2x1
jax: 0.10.0
libtpu: 0.0.40
codegen_flags: <defaults>
</compile_context>

<pallas_src>
import functools

import jax
import jax.numpy as jnp
from jax.experimental import pallas as pl
from jax.experimental.pallas import tpu as pltpu


def _leaky_relu(x, slope):
    return jnp.where(x > 0, x, slope * x)


# ----------------------------------------------------------------------------
# Fused Decode5 kernel: pairwise sum -> leaky_relu -> Linear -> leaky_relu ->
# Linear (lane-padded) -> optional transform -> dense store.
# ----------------------------------------------------------------------------
def decode5_kernel(v_ref, w1_ref, b1_ref, w2_ref, b2_ref, out_ref, *,
                   negative_slope, out_transform):
    v = v_ref[...]                                       # (bb, N, D)
    bb, n, d = v.shape

    # e_in[b, i, j, :] = v[b, i, :] + v[b, j, :]  (symmetric, matches torch unsqueeze(1)+unsqueeze(2))
    e_in = v[:, :, None, :] + v[:, None, :, :]           # (bb, N, N, D)

    # Flatten leading dims only (minor dim untouched) -> one big lane-dense matmul per stage.
    h = _leaky_relu(e_in, negative_slope).reshape(bb * n * n, d)          # (rows, D)
    e = jnp.dot(h, w1_ref[...], preferred_element_type=jnp.float32) + b1_ref[...]   # (rows, D)
    h2 = _leaky_relu(e, negative_slope)
    o = jnp.dot(h2, w2_ref[...], preferred_element_type=jnp.float32) + b2_ref[...]  # (rows, F_pad)

    if out_transform == "sigmoid":
        o = jax.nn.sigmoid(o)
    elif out_transform == "relu":
        o = jnp.maximum(o, 0.0)

    out_ref[...] = o                                      # full-lane, unmasked store


def decode5_forward(v, params, *, negative_slope=0.01, out_transform=None,
                    batch_block=1):
    """Decode5.forward (eval mode). Returns (B, N, N, F)."""
    B, N, D = v.shape
    w1, b1, w2, b2 = params["w1"], params["b1"], params["w2"], params["b2"]
    F = w2.shape[-1]
    assert B % batch_block == 0
    bb = batch_block

    # Zero-pad the output projection so the kernel's output block is 128-lane dense.
    f_pad = ((F + 127) // 128) * 128
    w2p = jnp.pad(w2, ((0, 0), (0, f_pad - F)))
    b2p = jnp.pad(b2, ((0, 0), (0, f_pad - F)))

    kernel = functools.partial(decode5_kernel,
                               negative_slope=negative_slope,
                               out_transform=out_transform)

    out_flat = pl.pallas_call(
        kernel,
        out_shape=jax.ShapeDtypeStruct((B * N * N, f_pad), jnp.float32),
        grid_spec=pltpu.PrefetchScalarGridSpec(
            num_scalar_prefetch=0,
            grid=(B // bb,),
            in_specs=[
                pl.BlockSpec((bb, N, D), lambda i: (i, 0, 0)),
                pl.BlockSpec((D, D), lambda i: (0, 0)),
                pl.BlockSpec((1, D), lambda i: (0, 0)),
                pl.BlockSpec((D, f_pad), lambda i: (0, 0)),
                pl.BlockSpec((1, f_pad), lambda i: (0, 0)),
            ],
            out_specs=pl.BlockSpec((bb * N * N, f_pad), lambda i: (i, 0)),
        ),
        compiler_params=pltpu.CompilerParams(dimension_semantics=("parallel",)),
    )(v, w1, b1, w2p, b2p)

    # Contiguous slice + reshape back to (B, N, N, F); padding columns are discarded.
    return out_flat[:, :F].reshape(B, N, N, F)


# ----------------------------------------------------------------------------
# Pure-JAX reference (mirrors the PyTorch module) for correctness checking.
# ----------------------------------------------------------------------------
def decode5_ref(v, params, *, negative_slope=0.01, out_transform=None):
    e_in = v[:, None, :, :] + v[:, :, None, :]
    h = jnp.where(e_in > 0, e_in, negative_slope * e_in)
    e = jnp.einsum("bijd,de->bije", h, params["w1"]) + params["b1"][0]
    h2 = jnp.where(e > 0, e, negative_slope * e)
    out = jnp.einsum("bijd,df->bijf", h2, params["w2"]) + params["b2"][0]
    if out_transform == "sigmoid":
        out = jax.nn.sigmoid(out)
    elif out_transform == "relu":
        out = jnp.maximum(out, 0.0)
    return out


if __name__ == "__main__":
    B, N, D, F = 2, 16, 32, 4   # batch, atoms, vertex dim D, output_feat

    key = jax.random.PRNGKey(0)
    kv, k1, k2, k3, k4 = jax.random.split(key, 5)
    v = jax.random.normal(kv, (B, N, D), jnp.float32)
    params = {
        # weights stored as (in, out) == torch Linear weight transposed
        "w1": 0.1 * jax.random.normal(k1, (D, D), jnp.float32),
        "b1": 0.01 * jax.random.normal(k2, (1, D), jnp.float32),
        "w2": 0.1 * jax.random.normal(k3, (D, F), jnp.float32),
        "b2": 0.01 * jax.random.normal(k4, (1, F), jnp.float32),
    }

    ref = decode5_ref(v, params)

    # Path 1: grid=(B,) parallel -- megacore sharding on dual-TC v7x.
    fwd_parallel = jax.jit(functools.partial(decode5_forward, batch_block=1))
    out_p = jax.block_until_ready(fwd_parallel(v, params))

    # Path 2: batch folded into matmul rows, single grid step -- best on single-TC v5e/v6e.
    fwd_folded = jax.jit(functools.partial(decode5_forward, batch_block=B))
    out_f = jax.block_until_ready(fwd_folded(v, params))

    for out in (out_p, out_f):
        assert out.shape == (B, N, N, F)
        assert bool(jnp.all(jnp.isfinite(out)))
        assert bool(jnp.allclose(out, ref, atol=1e-4, rtol=1e-4))

    print("KERNEL_OK")
</pallas_src>

<mosaic_0001>
module attributes {stable_mosaic.version = 11 : i64} {
  func.func @decode5_kernel(%arg0: i32, %arg1: memref<1x16x32xf32, #tpu.memory_space<vmem>>, %arg2: memref<32x32xf32, #tpu.memory_space<vmem>>, %arg3: memref<1x32xf32, #tpu.memory_space<vmem>>, %arg4: memref<32x128xf32, #tpu.memory_space<vmem>>, %arg5: memref<1x128xf32, #tpu.memory_space<vmem>>, %arg6: memref<256x128xf32, #tpu.memory_space<vmem>>) attributes {dimension_semantics = [#tpu.dimension_semantics<parallel>], iteration_bounds = array<i64: 2>, scalar_prefetch = 0 : i64, scratch_operands = 0 : i64, tpu.core_type = #tpu.core_type<tc>, window_params = [{transform_indices = @transform_0, window_bounds = array<i64: 1, 16, 32>}, {pipeline_mode = #tpu.pipeline_mode<synchronous>, transform_indices = @transform_1, window_bounds = array<i64: 32, 32>}, {pipeline_mode = #tpu.pipeline_mode<synchronous>, transform_indices = @transform_2, window_bounds = array<i64: 1, 32>}, {pipeline_mode = #tpu.pipeline_mode<synchronous>, transform_indices = @transform_3, window_bounds = array<i64: 32, 128>}, {pipeline_mode = #tpu.pipeline_mode<synchronous>, transform_indices = @transform_4, window_bounds = array<i64: 1, 128>}, {transform_indices = @transform_5, window_bounds = array<i64: 256, 128>}]} {
    %c0 = arith.constant 0 : index
    %c0_0 = arith.constant 0 : index
    %c0_1 = arith.constant 0 : index
    %0 = vector.load %arg1[%c0, %c0_0, %c0_1] : memref<1x16x32xf32, #tpu.memory_space<vmem>>, vector<1x16x32xf32>
    %1 = vector.shape_cast %0 : vector<1x16x32xf32> to vector<1x16x1x32xf32>
    %2 = vector.shape_cast %0 : vector<1x16x32xf32> to vector<1x1x16x32xf32>
    %3 = vector.broadcast %1 : vector<1x16x1x32xf32> to vector<1x16x16x32xf32>
    %4 = vector.broadcast %2 : vector<1x1x16x32xf32> to vector<1x16x16x32xf32>
    %5 = arith.addf %3, %4 : vector<1x16x16x32xf32>
    %cst = arith.constant 0.000000e+00 : f32
    %6 = vector.broadcast %cst : f32 to vector<1x16x16x32xf32>
    %7 = arith.cmpf ogt, %5, %6 : vector<1x16x16x32xf32>
    %cst_2 = arith.constant 0.00999999977 : f32
    %8 = vector.broadcast %cst_2 : f32 to vector<1x16x16x32xf32>
    %9 = arith.mulf %8, %5 : vector<1x16x16x32xf32>
    %10 = arith.select %7, %5, %9 : vector<1x16x16x32xi1>, vector<1x16x16x32xf32>
    %11 = vector.shape_cast %10 : vector<1x16x16x32xf32> to vector<256x32xf32>
    %c0_3 = arith.constant 0 : index
    %c0_4 = arith.constant 0 : index
    %12 = vector.load %arg2[%c0_3, %c0_4] : memref<32x32xf32, #tpu.memory_space<vmem>>, vector<32x32xf32>
    %cst_5 = arith.constant dense<0.000000e+00> : vector<256x32xf32>
    %13 = tpu.matmul %11, %12, %cst_5 {dimension_numbers = #tpu.dot_dimension_numbers<[1], [0], [0], [1], [0, 0, 1, 1], [], []>} : vector<256x32xf32>, vector<32x32xf32>, vector<256x32xf32> -> vector<256x32xf32>
    %c0_6 = arith.constant 0 : index
    %c0_7 = arith.constant 0 : index
    %14 = vector.load %arg3[%c0_6, %c0_7] : memref<1x32xf32, #tpu.memory_space<vmem>>, vector<1x32xf32>
    %15 = vector.broadcast %14 : vector<1x32xf32> to vector<256x32xf32>
    %16 = arith.addf %13, %15 : vector<256x32xf32>
    %cst_8 = arith.constant 0.000000e+00 : f32
    %17 = vector.broadcast %cst_8 : f32 to vector<256x32xf32>
    %18 = arith.cmpf ogt, %16, %17 : vector<256x32xf32>
    %cst_9 = arith.constant 0.00999999977 : f32
    %19 = vector.broadcast %cst_9 : f32 to vector<256x32xf32>
    %20 = arith.mulf %19, %16 : vector<256x32xf32>
    %21 = arith.select %18, %16, %20 : vector<256x32xi1>, vector<256x32xf32>
    %c0_10 = arith.constant 0 : index
    %c0_11 = arith.constant 0 : index
    %22 = vector.load %arg4[%c0_10, %c0_11] : memref<32x128xf32, #tpu.memory_space<vmem>>, vector<32x128xf32>
    %cst_12 = arith.constant dense<0.000000e+00> : vector<256x128xf32>
    %23 = tpu.matmul %21, %22, %cst_12 {dimension_numbers = #tpu.dot_dimension_numbers<[1], [0], [0], [1], [0, 0, 1, 1], [], []>} : vector<256x32xf32>, vector<32x128xf32>, vector<256x128xf32> -> vector<256x128xf32>
    %c0_13 = arith.constant 0 : index
    %c0_14 = arith.constant 0 : index
    %24 = vector.load %arg5[%c0_13, %c0_14] : memref<1x128xf32, #tpu.memory_space<vmem>>, vector<1x128xf32>
    %25 = vector.broadcast %24 : vector<1x128xf32> to vector<256x128xf32>
    %26 = arith.addf %23, %25 : vector<256x128xf32>
    %c0_15 = arith.constant 0 : index
    %c0_16 = arith.constant 0 : index
    %27 = vector.load %arg6[%c0_15, %c0_16] : memref<256x128xf32, #tpu.memory_space<vmem>>, vector<256x128xf32>
    tpu.vector_store %arg6[%c0_15, %c0_16], %26 {strides = array<i32>} : memref<256x128xf32, #tpu.memory_space<vmem>>, vector<256x128xf32>,
    return
  }
  func.func @transform_0(%arg0: i32) -> (i32, i32, i32) {
    %c0_i32 = arith.constant 0 : i32
    %c0_i32_0 = arith.constant 0 : i32
    %c0_i32_1 = arith.constant 0 : i32
    return %arg0, %c0_i32, %c0_i32_0 : i32, i32, i32
  }
  func.func @transform_1(%arg0: i32) -> (i32, i32) {
    %c0_i32 = arith.constant 0 : i32
    %c0_i32_0 = arith.constant 0 : i32
    %c0_i32_1 = arith.constant 0 : i32
    return %c0_i32, %c0_i32_0 : i32, i32
  }
  func.func @transform_2(%arg0: i32) -> (i32, i32) {
    %c0_i32 = arith.constant 0 : i32
    %c0_i32_0 = arith.constant 0 : i32
    %c0_i32_1 = arith.constant 0 : i32
    return %c0_i32, %c0_i32_0 : i32, i32
  }
  func.func @transform_3(%arg0: i32) -> (i32, i32) {
    %c0_i32 = arith.constant 0 : i32
    %c0_i32_0 = arith.constant 0 : i32
    %c0_i32_1 = arith.constant 0 : i32
    return %c0_i32, %c0_i32_0 : i32, i32
  }
  func.func @transform_4(%arg0: i32) -> (i32, i32) {
    %c0_i32 = arith.constant 0 : i32
    %c0_i32_0 = arith.constant 0 : i32
    %c0_i32_1 = arith.constant 0 : i32
    return %c0_i32, %c0_i32_0 : i32, i32
  }
  func.func @transform_5(%arg0: i32) -> (i32, i32) {
    %c0_i32 = arith.constant 0 : i32
    %c0_i32_0 = arith.constant 0 : i32
    return %arg0, %c0_i32 : i32, i32
  }
}

</mosaic_0001>

<bundles_post_ra>
// kernel: decode5_forward.1
= control target key start
LH: loop header
LB: loop body
LE: loop exit
PB: predicated region body
PF: predicated region fallthrough
CT: control target
= control target key end

     0   :  { %s1713_s18 = smov 0   ;;  %s2006_s0 = inlined_call_operand.vmem [shape: f32[2,16,32], index: 0, kind: input, shape index: {}]   ;;  %s2007_s1 = inlined_call_operand.vmem [shape: f32[32,32], index: 1, kind: input, shape index: {}]   ;;  %s2008_s2 = inlined_call_operand.vmem [shape: f32[1,32], index: 2, kind: input, shape index: {}]   ;;  %s2009_s3 = inlined_call_operand.vmem [shape: f32[32,128], index: 3, kind: input, shape index: {}]   ;;  %s2010_s4 = inlined_call_operand.vmem [shape: f32[1,128], index: 4, kind: input, shape index: {}]   ;;  %s2011_s5 = inlined_call_operand.vmem [shape: f32[512,128], index: 5, kind: output, shape index: {}]  }
   0x1 LB: > { %s1719_s19 = sadd.s32 4294967295, %s1680_s18   ;;  %p1389_p0 = scmp.ge.s32.totalorder %s1680_s18, 1  ;;  %s1680_s18 = sphi %s1713_s18, %s15_s18  }
   0x2   : > { %p187_p1 = scmp.lt.s32.totalorder %s1680_s18, 3 }
   0x4   : > { %p188_p2 = pnand %p1389_p0, %p187_p1 }
   0x5   : > { %v536_v0 = vld [vmem:[%s2007_s1] sm:$0xff] (!%p188_p2)  ;;  %v537_v1 = vld [vmem:[%s2007_s1 + $0x8] sm:$0xff] (!%p188_p2)  ;;  %v538_v2 = vld [vmem:[%s2007_s1 + $0x10] sm:$0xff] (!%p188_p2)  ;;  %p215_p3 = scmp.lt.s32.totalorder (!%p188_p2), %s1719_s19, 1  ;;  %v234_v3 = vlaneseq (!%p188_p2)  ;;  %v1682_v6 = vmov (!%p188_p2), 1966171168  }
   0x6   : > { %191 = sbr.rel (%p188_p2) target bundleno = 525 (0x20d), region = 40  ;;  %v1647_v4 = vpack.c.bf16 (!%p188_p2), %v537_v1, %v536_v0  ;;  %v539_v5 = vld [vmem:[%s2007_s1 + $0x18] sm:$0xff] (!%p188_p2)  ;;  %v232_v7 = vunpack.c.l.s4 (!%p188_p2), %v1682_v6  ;;  %vm547_vm0 = vcmask (!%p188_p2), 261120   ;;  %s1392_s20 = sshll.u32 (!%p188_p2), %s1719_s19, 5 }
   0x7   : > { %v1651_v8 = vpack.c.bf16 (!%p188_p2), %v539_v5, %v538_v2  ;;  %v235_v9 = vshrl.u32 (!%p188_p2), %v234_v3, 7  ;;  %p221_p4 = scmp.lt.s32.totalorder (!%p188_p2), %s1392_s20, 63 }
   0x8   : > { %1648 = vmatprep.subr.bf16.mxu0 (!%p188_p2), %v1647_v4  ;;  %v233_v10 = vunpack.c.0.s8 (!%p188_p2), %v232_v7 }
   0x9   : > { %1650 = vmatpush3.bf16.msra.mxu0 (!%p188_p2), %v1647_v4  ;;  %v1746_v14 = vsub.s32 (!%p188_p2), 0, %v235_v9 }
   0xa   : > { %1652 = vmatprep.subr.bf16.mxu0 (!%p188_p2), %v1651_v8  ;;  %v1740_v11 = vsub.s32 (!%p188_p2), %v233_v10, %v235_v9 }
   0xd   : > { %s216_s28 = scalar_select %p215_p3, %s1719_s19, 1  ;;  %1654 = vmatpush3.bf16.msra.mxu0 %v1651_v8 }
   0xe   : > { %s2013_s20 = smov (!%p221_p4, %s1392_s20), 63 }
   0xf   : > { %s1462_s29 = sshll.u32 %s216_s28, 4  ;;  %s1393_s21 = sshll.u32 %s2013_s20, 3 }
  0x10   : > { %s219_s7 = scalar_lea.vmem %s2006_s0, %s1462_s29  ;;  %s1937_s26 = scalar_lea.vmem %s2011_s5, %s1393_s21 }
  0x11   : > { %v1742_v12 = vld [vmem:[%s219_s7] sm:$0xff]  ;;  %v1752_v19 = vld [vmem:[%s219_s7 + $0x8] sm:$0xff] }
  0x12   : > { %v237_v13 = vrot.slane %v1742_v12, %v1740_v11  ;;  %v230_v15 = vcombine.high %v1742_v12, %v1742_v12  ;;  %v286_v55 = vrot.slane %v1752_v19, %v1740_v11 }
  0x14   : > { %v245_v16 = vcombine.high %v237_v13, %v237_v13  ;;  %v253_v17 = vrot.slane %v237_v13, %v1740_v11  ;;  %v244_v18 = vrot.slane %v230_v15, %v1740_v11  ;;  %v302_v63 = vrot.slane %v286_v55, %v1740_v11 }
  0x15   : > { %v294_v0 = vcombine.high %v286_v55, %v286_v55 }
  0x16   : > { %v275_v20 = vcombine.high %v253_v17, %v253_v17  ;;  %v331_v21 = vrot.slane %v253_v17, %v1746_v14  ;;  %v267_v22 = vrot.slane %v245_v16, %v1740_v11  ;;  %v260_v23 = vrot.slane %v244_v18, %v1740_v11 }
  0x17   : > { %v246_v24 = vcombine.high %v244_v18, %v244_v18  ;;  %v363_v8 = vrot.slane %v302_v63, %v1746_v14  ;;  %v316_v15 = vrot.slane %v294_v0, %v1740_v11 }
  0x18   : > { %v408_v25 = vadd.f32 %v331_v21, %v1742_v12  ;;  %v409_v26 = vadd.f32 %v331_v21, %v1752_v19  ;;  %v335_v27 = vrot.slane %v267_v22, %v1746_v14  ;;  %v339_v28 = vrot.slane %v275_v20, %v1746_v14 }
  0x19   : > { %v277_v29 = vcombine.high %v267_v22, %v267_v22  ;;  %v347_v30 = vrot.slane %v260_v23, %v1746_v14  ;;  %v274_v31 = vrot.slane %v246_v24, %v1740_v11  ;;  %v276_v51 = vcombine.high %v260_v23, %v260_v23 }
  0x1a   : > { %vm440_vm1 = vcmp.gt.f32.partialorder %v408_v25, 0.0  ;;  %v472_v32 = vmul.f32 0.01, %v408_v25  ;;  %vm441_vm2 = vcmp.gt.f32.partialorder %v409_v26, 0.0  ;;  %v473_v33 = vmul.f32 0.01, %v409_v26 }
  0x1b   : > { %v410_v34 = vadd.f32 %v335_v27, %v1742_v12  ;;  %v411_v35 = vadd.f32 %v335_v27, %v1752_v19  ;;  %v412_v36 = vadd.f32 %v339_v28, %v1742_v12  ;;  %v413_v37 = vadd.f32 %v339_v28, %v1752_v19 }
  0x1c   : > { %v504_v38 = vsel %vm440_vm1, %v408_v25, %v472_v32  ;;  %v505_v39 = vsel %vm441_vm2, %v409_v26, %v473_v33  ;;  %v343_v40 = vrot.slane %v277_v29, %v1746_v14  ;;  %v416_v41 = vadd.f32 %v347_v30, %v1742_v12 }
  0x1d   : > { %1543 = vmatprep.mubr.msk.f32.mxu0 %vm547_vm0, %v504_v38  ;;  %vm442_vm3 = vcmp.gt.f32.partialorder %v410_v34, 0.0  ;;  %v474_v42 = vmul.f32 0.01, %v410_v34  ;;  %vm443_vm4 = vcmp.gt.f32.partialorder %v411_v35, 0.0  ;;  %v475_v43 = vmul.f32 0.01, %v411_v35 }
  0x1e   : > { %1544 = vmatmul.mubr.msk.f32.vlgmr.msra.gmra.mrb[0].mxu0 %vm547_vm0, %v505_v39  ;;  %vm444_vm5 = vcmp.gt.f32.partialorder %v412_v36, 0.0  ;;  %v476_v44 = vmul.f32 0.01, %v412_v36  ;;  %vm445_vm6 = vcmp.gt.f32.partialorder %v413_v37, 0.0  ;;  %v477_v45 = vmul.f32 0.01, %v413_v37 }
  0x1f   : > { %v506_v46 = vsel %vm442_vm3, %v410_v34, %v474_v42  ;;  %v507_v47 = vsel %vm443_vm4, %v411_v35, %v475_v43  ;;  %v414_v48 = vadd.f32 %v343_v40, %v1742_v12  ;;  %v415_v49 = vadd.f32 %v343_v40, %v1752_v19 }
  0x20   : > { %1546 = vmatprep.mubr.msk.f32.mxu0 %vm547_vm0, %v506_v46  ;;  %v508_v50 = vsel %vm444_vm5, %v412_v36, %v476_v44  ;;  %v509_v53 = vsel %vm445_vm6, %v413_v37, %v477_v45  ;;  %vm448_vm8 = vcmp.gt.f32.partialorder %v416_v41, 0.0  ;;  %v351_v54 = vrot.slane %v274_v31, %v1746_v14 }
  0x21   : > { %vm446_vm7 = vcmp.gt.f32.partialorder %v414_v48, 0.0  ;;  %v478_v52 = vmul.f32 0.01, %v414_v48  ;;  %vm447_vm9 = vcmp.gt.f32.partialorder %v415_v49, 0.0  ;;  %v479_v56 = vmul.f32 0.01, %v415_v49 }
  0x22   : > { %1547 = vmatmul.mubr.msk.f32.gmra.mrb[2].mxu0 %vm547_vm0, %v507_v47  ;;  %v480_v57 = vmul.f32 0.01, %v416_v41  ;;  %v417_v58 = vadd.f32 %v347_v30, %v1752_v19  ;;  %v418_v60 = vadd.f32 %v351_v54, %v1742_v12  ;;  %v355_v61 = vrot.slane %v276_v51, %v1746_v14 }
  0x23   : > { %1549 = vmatprep.mubr.msk.f32.mxu0 %vm547_vm0, %v508_v50  ;;  %v510_v59 = vsel %vm446_vm7, %v414_v48, %v478_v52  ;;  %v278_v62 = vcombine.high %v274_v31, %v274_v31  ;;  %v511_v1 = vsel %vm447_vm9, %v415_v49, %v479_v56  ;;  %v419_v4 = vadd.f32 %v351_v54, %v1752_v19 }
  0x24   : > { %v512_v2 = vsel %vm448_vm8, %v416_v41, %v480_v57  ;;  %v481_v3 = vmul.f32 0.01, %v417_v58  ;;  %vm449_vm10 = vcmp.gt.f32.partialorder %v417_v58, 0.0  ;;  %v482_v5 = vmul.f32 0.01, %v418_v60 }
  0x25   : > { %v420_v6 = vadd.f32 %v355_v61, %v1742_v12  ;;  %v359_v7 = vrot.slane %v278_v62, %v1746_v14  ;;  %vm450_vm11 = vcmp.gt.f32.partialorder %v418_v60, 0.0  ;;  %v483_v10 = vmul.f32 0.01, %v419_v4 }
  0x26   : > { %1550 = vmatmul.mubr.msk.f32.gmra.mrb[4].mxu0 %vm547_vm0, %v509_v53  ;;  %v513_v9 = vsel %vm449_vm10, %v417_v58, %v481_v3  ;;  %v421_v13 = vadd.f32 %v355_v61, %v1752_v19  ;;  %v514_v16 = vsel %vm450_vm11, %v418_v60, %v482_v5  ;;  %vm451_vm12 = vcmp.gt.f32.partialorder %v419_v4, 0.0 }
  0x27   : > { %1552 = vmatprep.mubr.msk.f32.mxu0 %vm547_vm0, %v510_v59  ;;  %v484_v17 = vmul.f32 0.01, %v420_v6  ;;  %v422_v18 = vadd.f32 %v359_v7, %v1742_v12  ;;  %vm452_vm13 = vcmp.gt.f32.partialorder %v420_v6, 0.0  ;;  %v424_v20 = vadd.f32 %v363_v8, %v1742_v12 }
  0x28   : > { %v279_v21 = vcombine.high %v1752_v19, %v1752_v19  ;;  %v515_v22 = vsel %vm451_vm12, %v419_v4, %v483_v10  ;;  %v485_v23 = vmul.f32 0.01, %v421_v13  ;;  %v423_v24 = vadd.f32 %v359_v7, %v1752_v19 }
  0x29   : > { %v324_v25 = vcombine.high %v302_v63, %v302_v63  ;;  %v516_v26 = vsel %vm452_vm13, %v420_v6, %v484_v17  ;;  %vm453_vm14 = vcmp.gt.f32.partialorder %v421_v13, 0.0  ;;  %v486_v27 = vmul.f32 0.01, %v422_v18 }
  0x2a   : > { %1553 = vmatmul.mubr.msk.f32.gmra.mrb[6].mxu0 %vm547_vm0, %v511_v1  ;;  %v367_v28 = vrot.slane %v316_v15, %v1746_v14  ;;  %vm454_vm15 = vcmp.gt.f32.partialorder %v422_v18, 0.0  ;;  %v488_v29 = vmul.f32 0.01, %v424_v20  ;;  %v425_v30 = vadd.f32 %v363_v8, %v1752_v19 }
  0x2b   : > { %1555 = vmatprep.mubr.msk.f32.mxu0 %vm547_vm0, %v512_v2  ;;  %v293_v31 = vrot.slane %v279_v21, %v1740_v11  ;;  %v517_v32 = vsel %vm453_vm14, %v421_v13, %v485_v23  ;;  %vm455_vm1 = vcmp.gt.f32.partialorder %v423_v24, 0.0  ;;  %v487_v33 = vmul.f32 0.01, %v423_v24 }
  0x2c   : > { %vm456_vm2 = vcmp.gt.f32.partialorder %v424_v20, 0.0  ;;  %v518_v34 = vsel %vm454_vm15, %v422_v18, %v486_v27  ;;  %v426_v35 = vadd.f32 %v367_v28, %v1742_v12  ;;  %v371_v36 = vrot.slane %v324_v25, %v1746_v14 }
  0x2d   : > { %v326_v37 = vcombine.high %v316_v15, %v316_v15  ;;  %v520_v38 = vsel %vm456_vm2, %v424_v20, %v488_v29  ;;  %v489_v39 = vmul.f32 0.01, %v425_v30  ;;  %v519_v40 = vsel %vm455_vm1, %v423_v24, %v487_v33  ;;  %v968_v33 = vld [vmem:[%s2009_s3 + $0x18] sm:$0xff] }
  0x2e   : > { %1556 = vmatmul.mubr.msk.f32.gmra.mrb[8].mxu0 %vm547_vm0, %v513_v9  ;;  %v427_v41 = vadd.f32 %v367_v28, %v1752_v19  ;;  %v309_v42 = vrot.slane %v293_v31, %v1740_v11  ;;  %v295_v43 = vcombine.high %v293_v31, %v293_v31  ;;  %vm457_vm3 = vcmp.gt.f32.partialorder %v425_v30, 0.0 }
  0x2f   : > { %1558 = vmatprep.mubr.msk.f32.mxu0 %vm547_vm0, %v514_v16  ;;  %v490_v44 = vmul.f32 0.01, %v426_v35  ;;  %v428_v45 = vadd.f32 %v371_v36, %v1742_v12  ;;  %v375_v46 = vrot.slane %v326_v37, %v1746_v14  ;;  %vm458_vm4 = vcmp.gt.f32.partialorder %v426_v35, 0.0 }
  0x30   : > { %v429_v47 = vadd.f32 %v371_v36, %v1752_v19  ;;  %v521_v48 = vsel %vm457_vm3, %v425_v30, %v489_v39  ;;  %v491_v49 = vmul.f32 0.01, %v427_v41  ;;  %v379_v50 = vrot.slane %v309_v42, %v1746_v14  ;;  %v966_v30 = vld [vmem:[%s2009_s3 + $0x8] sm:$0xff] }
  0x31   : > { %v323_v51 = vrot.slane %v295_v43, %v1740_v11  ;;  %v522_v52 = vsel %vm458_vm4, %v426_v35, %v490_v44  ;;  %vm459_vm5 = vcmp.gt.f32.partialorder %v427_v41, 0.0  ;;  %v492_v53 = vmul.f32 0.01, %v428_v45  ;;  %v1862_v35 = vld [vmem:[%s2008_s2] ss:$0 sm:$0xff] }
  0x32   : > { %1559 = vmatmul.mubr.msk.f32.gmra.mrb[10].mxu0 %vm547_vm0, %v515_v22  ;;  %v430_v54 = vadd.f32 %v375_v46, %v1742_v12  ;;  %vm460_vm6 = vcmp.gt.f32.partialorder %v428_v45, 0.0  ;;  %v493_v55 = vmul.f32 0.01, %v429_v47  ;;  %v523_v56 = vsel %vm459_vm5, %v427_v41, %v491_v49 }
  0x33   : > { %1561 = vmatprep.mubr.msk.f32.mxu0 %vm547_vm0, %v516_v26  ;;  %vm461_vm7 = vcmp.gt.f32.partialorder %v429_v47, 0.0  ;;  %v431_v57 = vadd.f32 %v375_v46, %v1752_v19  ;;  %v432_v58 = vadd.f32 %v379_v50, %v1742_v12  ;;  %v524_v59 = vsel %vm460_vm6, %v428_v45, %v492_v53 }
  0x34   : > { %v494_v60 = vmul.f32 0.01, %v430_v54  ;;  %v383_v11 = vrot.slane %v323_v51, %v1746_v14  ;;  %v325_v61 = vcombine.high %v309_v42, %v309_v42  ;;  %vm462_vm8 = vcmp.gt.f32.partialorder %v430_v54, 0.0 }
  0x35   : > { %v525_v62 = vsel %vm461_vm7, %v429_v47, %v493_v55  ;;  %vm463_vm9 = vcmp.gt.f32.partialorder %v431_v57, 0.0  ;;  %v495_v63 = vmul.f32 0.01, %v431_v57  ;;  %v496_v0 = vmul.f32 0.01, %v432_v58 }
  0x36   : > { %1562 = vmatmul.mubr.msk.f32.gmra.mrb[12].mxu0 %vm547_vm0, %v517_v32  ;;  %v433_v1 = vadd.f32 %v379_v50, %v1752_v19  ;;  %v526_v2 = vsel %vm462_vm8, %v430_v54, %v494_v60  ;;  %v434_v3 = vadd.f32 %v383_v11, %v1742_v12  ;;  %v387_v4 = vrot.slane %v325_v61, %v1746_v14  ;;  %v967_v32 = vld [vmem:[%s2009_s3 + $0x10] sm:$0xff] }
  0x37   : > { %1564 = vmatprep.mubr.msk.f32.mxu0 %vm547_vm0, %v518_v34  ;;  %v327_v5 = vcombine.high %v323_v51, %v323_v51  ;;  %vm464_vm10 = vcmp.gt.f32.partialorder %v432_v58, 0.0  ;;  %v527_v6 = vsel %vm463_vm9, %v431_v57, %v495_v63  ;;  %v435_v8 = vadd.f32 %v383_v11, %v1752_v19 }
  0x38   : > { %vm465_vm11 = vcmp.gt.f32.partialorder %v433_v1, 0.0  ;;  %v497_v7 = vmul.f32 0.01, %v433_v1  ;;  %v528_v9 = vsel %vm464_vm10, %v432_v58, %v496_v0  ;;  %v498_v10 = vmul.f32 0.01, %v434_v3 }
  0x39   : > { %v436_v13 = vadd.f32 %v387_v4, %v1742_v12  ;;  %v391_v15 = vrot.slane %v327_v5, %v1746_v14  ;;  %vm466_vm12 = vcmp.gt.f32.partialorder %v434_v3, 0.0  ;;  %v499_v17 = vmul.f32 0.01, %v435_v8 }
  0x3a   : > { %1565 = vmatmul.mubr.msk.f32.gmra.mrb[14].mxu0 %vm547_vm0, %v519_v40  ;;  %v529_v16 = vsel %vm465_vm11, %v433_v1, %v497_v7  ;;  %v437_v18 = vadd.f32 %v387_v4, %v1752_v19  ;;  %v530_v20 = vsel %vm466_vm12, %v434_v3, %v498_v10  ;;  %vm467_vm13 = vcmp.gt.f32.partialorder %v435_v8, 0.0 }
  0x3b   : > { %1567 = vmatprep.mubr.msk.f32.mxu0 %vm547_vm0, %v520_v38  ;;  %v500_v21 = vmul.f32 0.01, %v436_v13  ;;  %v438_v22 = vadd.f32 %v391_v15, %v1742_v12  ;;  %vm468_vm14 = vcmp.gt.f32.partialorder %v436_v13, 0.0  ;;  %v531_v14 = vsel %vm467_vm13, %v435_v8, %v499_v17 }
  0x3c   : > { %v501_v23 = vmul.f32 0.01, %v437_v18  ;;  %v439_v24 = vadd.f32 %v391_v15, %v1752_v19  ;;  %vm469_vm15 = vcmp.gt.f32.partialorder %v437_v18, 0.0  ;;  %v965_v19 = vld [vmem:[%s2009_s3] sm:$0xff]  ;;  %v1659_v34 = vpack.c.bf16 %v968_v33, %v967_v32 }
  0x3d   : > { %v532_v25 = vsel %vm468_vm14, %v436_v13, %v500_v21  ;;  %v502_v26 = vmul.f32 0.01, %v438_v22  ;;  %vm470_vm1 = vcmp.gt.f32.partialorder %v438_v22, 0.0  ;;  %v1655_v31 = vpack.c.bf16 %v966_v30, %v965_v19 }
  0x3e   : > { %1568 = vmatmul.mubr.msk.f32.gmra.mrb[16].mxu0 %vm547_vm0, %v521_v48  ;;  %v533_v27 = vsel %vm469_vm15, %v437_v18, %v501_v23  ;;  %v503_v28 = vmul.f32 0.01, %v439_v24  ;;  %vm471_vm2 = vcmp.gt.f32.partialorder %v439_v24, 0.0 }
  0x3f   : > { %1570 = vmatprep.mubr.msk.f32.mxu0 %vm547_vm0, %v522_v52  ;;  %v534_v12 = vsel %vm470_vm1, %v438_v22, %v502_v26  ;;  %1656 = vmatprep.subr.bf16.mxu1 %v1655_v31 }
  0x40   : > { %v535_v29 = vsel %vm471_vm2, %v439_v24, %v503_v28  ;;  %1658 = vmatpush3.bf16.msra.mxu1 %v1655_v31 }
  0x41   : > { %1660 = vmatprep.subr.bf16.mxu1 %v1659_v34 }
  0x42   : > { %1571 = vmatmul.mubr.msk.f32.gmra.mrb[18].mxu0 %vm547_vm0, %v523_v56 }
  0x43   : > { %1573 = vmatprep.mubr.msk.f32.mxu0 %vm547_vm0, %v524_v59 }
  0x44   : > { %1662 = vmatpush3.bf16.msra.mxu1 %v1659_v34 }
  0x46   : > { %1574 = vmatmul.mubr.msk.f32.gmra.mrb[20].mxu0 %vm547_vm0, %v525_v62 }
  0x47   : > { %1576 = vmatprep.mubr.msk.f32.mxu0 %vm547_vm0, %v526_v2 }
  0x4a   : > { %1577 = vmatmul.mubr.msk.f32.gmra.mrb[22].mxu0 %vm547_vm0, %v527_v6 }
  0x4b   : > { %1579 = vmatprep.mubr.msk.f32.mxu0 %vm547_vm0, %v528_v9 }
  0x4e   : > { %1580 = vmatmul.mubr.msk.f32.gmra.mrb[24].mxu0 %vm547_vm0, %v529_v16 }
  0x4f   : > { %1582 = vmatprep.mubr.msk.f32.mxu0 %vm547_vm0, %v530_v20 }
  0x52   : > { %1583 = vmatmul.mubr.msk.f32.gmra.mrb[26].mxu0 %vm547_vm0, %v531_v14 }
  0x53   : > { %1585 = vmatprep.mubr.msk.f32.mxu0 %vm547_vm0, %v532_v25 }
  0x56   : > { %1586 = vmatmul.mubr.msk.f32.gmra.mrb[28].mxu0 %vm547_vm0, %v533_v27 }
  0x57   : > { %1588 = vmatprep.mubr.msk.f32.mxu0 %vm547_vm0, %v534_v12 }
  0x5a   : > { %1589 = vmatmul.mubr.msk.f32.gmra.mrb[30].mxu0 %vm547_vm0, %v535_v29 }
  0xf1   : > { %v1545_v36 = vpop.f32.mrb[0].mxu0 }
  0xf2   : > { %v716_v37 = vadd.f32 %v1545_v36, %v1862_v35  ;;  %v710_v38 = vpop.f32.mrb[1].mxu0 }
  0xf3   : > { %v711_v39 = vadd.f32 %v1862_v35, %v710_v38 }
  0xf4   : > { %v902_v40 = vmul.f32 0.01, %v716_v37  ;;  %vm870_vm3 = vcmp.gt.f32.partialorder %v716_v37, 0.0 }
  0xf5   : > { %v1548_v41 = vpop.f32.mrb[2].mxu0  ;;  %vm869_vm4 = vcmp.gt.f32.partialorder %v711_v39, 0.0  ;;  %v901_v42 = vmul.f32 0.01, %v711_v39 }
  0xf6   : > { %v726_v43 = vadd.f32 %v1548_v41, %v1862_v35  ;;  %v720_v44 = vpop.f32.mrb[3].mxu0  ;;  %v934_v48 = vsel %vm870_vm3, %v716_v37, %v902_v40 }
  0xf7   : > { %v721_v45 = vadd.f32 %v1862_v35, %v720_v44  ;;  %v933_v46 = vsel %vm869_vm4, %v711_v39, %v901_v42 }
  0xf8   : > { %v904_v47 = vmul.f32 0.01, %v726_v43  ;;  %1599 = vmatprep.mubr.msk.f32.mxu1 %vm547_vm0, %v933_v46  ;;  %vm872_vm5 = vcmp.gt.f32.partialorder %v726_v43, 0.0 }
  0xf9   : > { %vm871_vm6 = vcmp.gt.f32.partialorder %v721_v45, 0.0  ;;  %v903_v49 = vmul.f32 0.01, %v721_v45  ;;  %v1551_v50 = vpop.f32.mrb[4].mxu0  ;;  %1600 = vmatmul.mubr.msk.f32.vlgmr.msra.gmra.mrb[0].mxu1 %vm547_vm0, %v934_v48 }
  0xfa   : > { %v736_v51 = vadd.f32 %v1551_v50, %v1862_v35  ;;  %v730_v52 = vpop.f32.mrb[5].mxu0  ;;  %v936_v56 = vsel %vm872_vm5, %v726_v43, %v904_v47 }
  0xfb   : > { %v731_v53 = vadd.f32 %v1862_v35, %v730_v52  ;;  %v935_v54 = vsel %vm871_vm6, %v721_v45, %v903_v49 }
  0xfc   : > { %v906_v55 = vmul.f32 0.01, %v736_v51  ;;  %1602 = vmatprep.mubr.msk.f32.mxu1 %vm547_vm0, %v935_v54  ;;  %vm874_vm7 = vcmp.gt.f32.partialorder %v736_v51, 0.0 }
  0xfd   : > { %vm873_vm8 = vcmp.gt.f32.partialorder %v731_v53, 0.0  ;;  %v905_v57 = vmul.f32 0.01, %v731_v53  ;;  %v1554_v58 = vpop.f32.mrb[6].mxu0  ;;  %1603 = vmatmul.mubr.msk.f32.gmra.mrb[2].mxu1 %vm547_vm0, %v936_v56 }
  0xfe   : > { %v746_v59 = vadd.f32 %v1554_v58, %v1862_v35  ;;  %v740_v60 = vpop.f32.mrb[7].mxu0  ;;  %v938_v63 = vsel %vm874_vm7, %v736_v51, %v906_v55 }
  0xff   : > { %v741_v11 = vadd.f32 %v1862_v35, %v740_v60  ;;  %v937_v61 = vsel %vm873_vm8, %v731_v53, %v905_v57 }
 0x100   : > { %v908_v62 = vmul.f32 0.01, %v746_v59  ;;  %1605 = vmatprep.mubr.msk.f32.mxu1 %vm547_vm0, %v937_v61  ;;  %vm876_vm9 = vcmp.gt.f32.partialorder %v746_v59, 0.0 }
 0x101   : > { %vm875_vm10 = vcmp.gt.f32.partialorder %v741_v11, 0.0  ;;  %v907_v0 = vmul.f32 0.01, %v741_v11  ;;  %v1557_v1 = vpop.f32.mrb[8].mxu0  ;;  %1606 = vmatmul.mubr.msk.f32.gmra.mrb[4].mxu1 %vm547_vm0, %v938_v63 }
 0x102   : > { %v756_v2 = vadd.f32 %v1557_v1, %v1862_v35  ;;  %v750_v3 = vpop.f32.mrb[9].mxu0  ;;  %v940_v7 = vsel %vm876_vm9, %v746_v59, %v908_v62 }
 0x103   : > { %v751_v4 = vadd.f32 %v1862_v35, %v750_v3  ;;  %v939_v5 = vsel %vm875_vm10, %v741_v11, %v907_v0 }
 0x104   : > { %v910_v6 = vmul.f32 0.01, %v756_v2  ;;  %1608 = vmatprep.mubr.msk.f32.mxu1 %vm547_vm0, %v939_v5  ;;  %vm878_vm11 = vcmp.gt.f32.partialorder %v756_v2, 0.0 }
 0x105   : > { %vm877_vm12 = vcmp.gt.f32.partialorder %v751_v4, 0.0  ;;  %v909_v8 = vmul.f32 0.01, %v751_v4  ;;  %v1560_v9 = vpop.f32.mrb[10].mxu0  ;;  %1609 = vmatmul.mubr.msk.f32.gmra.mrb[6].mxu1 %vm547_vm0, %v940_v7 }
 0x106   : > { %v766_v10 = vadd.f32 %v1560_v9, %v1862_v35  ;;  %v760_v13 = vpop.f32.mrb[11].mxu0  ;;  %v942_v18 = vsel %vm878_vm11, %v756_v2, %v910_v6 }
 0x107   : > { %v761_v15 = vadd.f32 %v1862_v35, %v760_v13  ;;  %v941_v16 = vsel %vm877_vm12, %v751_v4, %v909_v8 }
 0x108   : > { %v912_v17 = vmul.f32 0.01, %v766_v10  ;;  %1611 = vmatprep.mubr.msk.f32.mxu1 %vm547_vm0, %v941_v16  ;;  %vm880_vm13 = vcmp.gt.f32.partialorder %v766_v10, 0.0 }
 0x109   : > { %vm879_vm14 = vcmp.gt.f32.partialorder %v761_v15, 0.0  ;;  %v911_v20 = vmul.f32 0.01, %v761_v15  ;;  %v1563_v21 = vpop.f32.mrb[12].mxu0  ;;  %1612 = vmatmul.mubr.msk.f32.gmra.mrb[8].mxu1 %vm547_vm0, %v942_v18 }
 0x10a   : > { %v776_v22 = vadd.f32 %v1563_v21, %v1862_v35  ;;  %v770_v14 = vpop.f32.mrb[13].mxu0  ;;  %v944_v26 = vsel %vm880_vm13, %v766_v10, %v912_v17 }
 0x10b   : > { %v771_v23 = vadd.f32 %v1862_v35, %v770_v14  ;;  %v943_v24 = vsel %vm879_vm14, %v761_v15, %v911_v20 }
 0x10c   : > { %v914_v25 = vmul.f32 0.01, %v776_v22  ;;  %1614 = vmatprep.mubr.msk.f32.mxu1 %vm547_vm0, %v943_v24  ;;  %vm882_vm15 = vcmp.gt.f32.partialorder %v776_v22, 0.0 }
 0x10d   : > { %vm881_vm1 = vcmp.gt.f32.partialorder %v771_v23, 0.0  ;;  %v913_v27 = vmul.f32 0.01, %v771_v23  ;;  %v1566_v28 = vpop.f32.mrb[14].mxu0  ;;  %1615 = vmatmul.mubr.msk.f32.gmra.mrb[10].mxu1 %vm547_vm0, %v944_v26 }
 0x10e   : > { %v786_v12 = vadd.f32 %v1566_v28, %v1862_v35  ;;  %v780_v29 = vpop.f32.mrb[15].mxu0  ;;  %v946_v32 = vsel %vm882_vm15, %v776_v22, %v914_v25 }
 0x10f   : > { %v781_v19 = vadd.f32 %v1862_v35, %v780_v29  ;;  %v945_v30 = vsel %vm881_vm1, %v771_v23, %v913_v27 }
 0x110   : > { %v916_v31 = vmul.f32 0.01, %v786_v12  ;;  %1617 = vmatprep.mubr.msk.f32.mxu1 %vm547_vm0, %v945_v30  ;;  %vm884_vm2 = vcmp.gt.f32.partialorder %v786_v12, 0.0 }
 0x111   : > { %vm883_vm3 = vcmp.gt.f32.partialorder %v781_v19, 0.0  ;;  %v915_v33 = vmul.f32 0.01, %v781_v19  ;;  %v1569_v34 = vpop.f32.mrb[16].mxu0  ;;  %1618 = vmatmul.mubr.msk.f32.gmra.mrb[12].mxu1 %vm547_vm0, %v946_v32 }
 0x112   : > { %v796_v36 = vadd.f32 %v1569_v34, %v1862_v35  ;;  %v790_v37 = vpop.f32.mrb[17].mxu0  ;;  %v948_v41 = vsel %vm884_vm2, %v786_v12, %v916_v31 }
 0x113   : > { %v791_v38 = vadd.f32 %v1862_v35, %v790_v37  ;;  %v947_v39 = vsel %vm883_vm3, %v781_v19, %v915_v33 }
 0x114   : > { %v918_v40 = vmul.f32 0.01, %v796_v36  ;;  %1620 = vmatprep.mubr.msk.f32.mxu1 %vm547_vm0, %v947_v39  ;;  %vm886_vm4 = vcmp.gt.f32.partialorder %v796_v36, 0.0 }
 0x115   : > { %vm885_vm5 = vcmp.gt.f32.partialorder %v791_v38, 0.0  ;;  %v917_v42 = vmul.f32 0.01, %v791_v38  ;;  %v1572_v43 = vpop.f32.mrb[18].mxu0  ;;  %1621 = vmatmul.mubr.msk.f32.gmra.mrb[14].mxu1 %vm547_vm0, %v948_v41 }
 0x116   : > { %v806_v44 = vadd.f32 %v1572_v43, %v1862_v35  ;;  %v800_v45 = vpop.f32.mrb[19].mxu0  ;;  %v950_v49 = vsel %vm886_vm4, %v796_v36, %v918_v40 }
 0x117   : > { %v801_v46 = vadd.f32 %v1862_v35, %v800_v45  ;;  %v949_v47 = vsel %vm885_vm5, %v791_v38, %v917_v42 }
 0x118   : > { %v920_v48 = vmul.f32 0.01, %v806_v44  ;;  %1623 = vmatprep.mubr.msk.f32.mxu1 %vm547_vm0, %v949_v47  ;;  %vm888_vm6 = vcmp.gt.f32.partialorder %v806_v44, 0.0 }
 0x119   : > { %vm887_vm7 = vcmp.gt.f32.partialorder %v801_v46, 0.0  ;;  %v919_v50 = vmul.f32 0.01, %v801_v46  ;;  %v1575_v51 = vpop.f32.mrb[20].mxu0  ;;  %1624 = vmatmul.mubr.msk.f32.gmra.mrb[16].mxu1 %vm547_vm0, %v950_v49 }
 0x11a   : > { %v816_v52 = vadd.f32 %v1575_v51, %v1862_v35  ;;  %v810_v53 = vpop.f32.mrb[21].mxu0  ;;  %v952_v57 = vsel %vm888_vm6, %v806_v44, %v920_v48 }
 0x11b   : > { %v811_v54 = vadd.f32 %v1862_v35, %v810_v53  ;;  %v951_v55 = vsel %vm887_vm7, %v801_v46, %v919_v50 }
 0x11c   : > { %v922_v56 = vmul.f32 0.01, %v816_v52  ;;  %1626 = vmatprep.mubr.msk.f32.mxu1 %vm547_vm0, %v951_v55  ;;  %vm890_vm8 = vcmp.gt.f32.partialorder %v816_v52, 0.0 }
 0x11d   : > { %vm889_vm9 = vcmp.gt.f32.partialorder %v811_v54, 0.0  ;;  %v921_v58 = vmul.f32 0.01, %v811_v54  ;;  %v1578_v59 = vpop.f32.mrb[22].mxu0  ;;  %1627 = vmatmul.mubr.msk.f32.gmra.mrb[18].mxu1 %vm547_vm0, %v952_v57 }
 0x11e   : > { %v826_v60 = vadd.f32 %v1578_v59, %v1862_v35  ;;  %v820_v11 = vpop.f32.mrb[23].mxu0  ;;  %v954_v0 = vsel %vm890_vm8, %v816_v52, %v922_v56 }
 0x11f   : > { %v821_v61 = vadd.f32 %v1862_v35, %v820_v11  ;;  %v953_v62 = vsel %vm889_vm9, %v811_v54, %v921_v58 }
 0x120   : > { %v924_v63 = vmul.f32 0.01, %v826_v60  ;;  %1629 = vmatprep.mubr.msk.f32.mxu1 %vm547_vm0, %v953_v62  ;;  %vm892_vm10 = vcmp.gt.f32.partialorder %v826_v60, 0.0 }
 0x121   : > { %vm891_vm11 = vcmp.gt.f32.partialorder %v821_v61, 0.0  ;;  %v923_v1 = vmul.f32 0.01, %v821_v61  ;;  %v1581_v2 = vpop.f32.mrb[24].mxu0  ;;  %1630 = vmatmul.mubr.msk.f32.gmra.mrb[20].mxu1 %vm547_vm0, %v954_v0 }
 0x122   : > { %v836_v3 = vadd.f32 %v1581_v2, %v1862_v35  ;;  %v830_v4 = vpop.f32.mrb[25].mxu0  ;;  %v956_v8 = vsel %vm892_vm10, %v826_v60, %v924_v63 }
 0x123   : > { %v831_v5 = vadd.f32 %v1862_v35, %v830_v4  ;;  %v955_v6 = vsel %vm891_vm11, %v821_v61, %v923_v1 }
 0x124   : > { %v926_v7 = vmul.f32 0.01, %v836_v3  ;;  %1632 = vmatprep.mubr.msk.f32.mxu1 %vm547_vm0, %v955_v6  ;;  %vm894_vm12 = vcmp.gt.f32.partialorder %v836_v3, 0.0 }
 0x125   : > { %vm893_vm13 = vcmp.gt.f32.partialorder %v831_v5, 0.0  ;;  %v925_v9 = vmul.f32 0.01, %v831_v5  ;;  %v1584_v10 = vpop.f32.mrb[26].mxu0  ;;  %1633 = vmatmul.mubr.msk.f32.gmra.mrb[22].mxu1 %vm547_vm0, %v956_v8 }
 0x126   : > { %v846_v13 = vadd.f32 %v1584_v10, %v1862_v35  ;;  %v840_v15 = vpop.f32.mrb[27].mxu0  ;;  %v958_v20 = vsel %vm894_vm12, %v836_v3, %v926_v7 }
 0x127   : > { %v841_v16 = vadd.f32 %v1862_v35, %v840_v15  ;;  %v957_v17 = vsel %vm893_vm13, %v831_v5, %v925_v9 }
 0x128   : > { %v928_v18 = vmul.f32 0.01, %v846_v13  ;;  %1635 = vmatprep.mubr.msk.f32.mxu1 %vm547_vm0, %v957_v17  ;;  %vm896_vm14 = vcmp.gt.f32.partialorder %v846_v13, 0.0 }
 0x129   : > { %vm895_vm15 = vcmp.gt.f32.partialorder %v841_v16, 0.0  ;;  %v927_v21 = vmul.f32 0.01, %v841_v16  ;;  %v1587_v22 = vpop.f32.mrb[28].mxu0  ;;  %1636 = vmatmul.mubr.msk.f32.gmra.mrb[24].mxu1 %vm547_vm0, %v958_v20 }
 0x12a   : > { %v856_v14 = vadd.f32 %v1587_v22, %v1862_v35  ;;  %v850_v23 = vpop.f32.mrb[29].mxu0  ;;  %v960_v27 = vsel %vm896_vm14, %v846_v13, %v928_v18 }
 0x12b   : > { %v851_v24 = vadd.f32 %v1862_v35, %v850_v23  ;;  %v959_v25 = vsel %vm895_vm15, %v841_v16, %v927_v21 }
 0x12c   : > { %v930_v26 = vmul.f32 0.01, %v856_v14  ;;  %1638 = vmatprep.mubr.msk.f32.mxu1 %vm547_vm0, %v959_v25  ;;  %vm898_vm1 = vcmp.gt.f32.partialorder %v856_v14, 0.0 }
 0x12d   : > { %vm897_vm2 = vcmp.gt.f32.partialorder %v851_v24, 0.0  ;;  %v929_v28 = vmul.f32 0.01, %v851_v24  ;;  %v1590_v12 = vpop.f32.mrb[30].mxu0  ;;  %1639 = vmatmul.mubr.msk.f32.gmra.mrb[26].mxu1 %vm547_vm0, %v960_v27 }
 0x12e   : > { %v866_v29 = vadd.f32 %v1590_v12, %v1862_v35  ;;  %v860_v19 = vpop.f32.mrb[31].mxu0  ;;  %v962_v33 = vsel %vm898_vm1, %v856_v14, %v930_v26 }
 0x12f   : > { %v861_v30 = vadd.f32 %v1862_v35, %v860_v19  ;;  %v961_v31 = vsel %vm897_vm2, %v851_v24, %v929_v28  ;;  %v1932_v35 = vld [vmem:[%s2010_s4] ss:$0 sm:$0xff] }
 0x130   : > { %v932_v32 = vmul.f32 0.01, %v866_v29  ;;  %1641 = vmatprep.mubr.msk.f32.mxu1 %vm547_vm0, %v961_v31  ;;  %vm900_vm3 = vcmp.gt.f32.partialorder %v866_v29, 0.0 }
 0x131   : > { %vm899_vm4 = vcmp.gt.f32.partialorder %v861_v30, 0.0  ;;  %v931_v34 = vmul.f32 0.01, %v861_v30  ;;  %1642 = vmatmul.mubr.msk.f32.gmra.mrb[28].mxu1 %vm547_vm0, %v962_v33 }
 0x132   : > { %v964_v37 = vsel %vm900_vm3, %v866_v29, %v932_v32 }
 0x133   : > { %v963_v36 = vsel %vm899_vm4, %v861_v30, %v931_v34 }
 0x134   : > { %1644 = vmatprep.mubr.msk.f32.mxu1 %vm547_vm0, %v963_v36 }
 0x135   : > { %1645 = vmatmul.mubr.msk.f32.gmra.mrb[30].mxu1 %vm547_vm0, %v964_v37 }
 0x1cc   : > { %v1601_v38 = vpop.f32.mrb[0].mxu1 }
 0x1cd   : > { %v1144_v39 = vadd.f32 %v1601_v38, %v1932_v35  ;;  %v1138_v40 = vpop.f32.mrb[1].mxu1 }
 0x1ce   : > { %v1139_v41 = vadd.f32 %v1932_v35, %v1138_v40 }
 0x1cf   : > { %1298 = vst [vmem:[%s1937_s26 + $0x8] sm:$0xff] %v1144_v39 }
 0x1d0   : > { %1297 = vst [vmem:[%s1937_s26] sm:$0xff] %v1139_v41  ;;  %v1604_v42 = vpop.f32.mrb[2].mxu1 }
 0x1d1   : > { %v1154_v43 = vadd.f32 %v1604_v42, %v1932_v35  ;;  %v1148_v44 = vpop.f32.mrb[3].mxu1 }
 0x1d2   : > { %v1149_v45 = vadd.f32 %v1932_v35, %v1148_v44 }
 0x1d3   : > { %1300 = vst [vmem:[%s1937_s26 + $0x18] sm:$0xff] %v1154_v43 }
 0x1d4   : > { %1299 = vst [vmem:[%s1937_s26 + $0x10] sm:$0xff] %v1149_v45  ;;  %v1607_v46 = vpop.f32.mrb[4].mxu1 }
 0x1d5   : > { %v1164_v47 = vadd.f32 %v1607_v46, %v1932_v35  ;;  %v1158_v48 = vpop.f32.mrb[5].mxu1 }
 0x1d6   : > { %v1159_v49 = vadd.f32 %v1932_v35, %v1158_v48 }
 0x1d7   : > { %1302 = vst [vmem:[%s1937_s26 + $0x28] sm:$0xff] %v1164_v47 }
 0x1d8   : > { %1301 = vst [vmem:[%s1937_s26 + $0x20] sm:$0xff] %v1159_v49  ;;  %v1610_v50 = vpop.f32.mrb[6].mxu1 }
 0x1d9   : > { %v1174_v51 = vadd.f32 %v1610_v50, %v1932_v35  ;;  %v1168_v52 = vpop.f32.mrb[7].mxu1 }
 0x1da   : > { %v1169_v53 = vadd.f32 %v1932_v35, %v1168_v52 }
 0x1db   : > { %1304 = vst [vmem:[%s1937_s26 + $0x38] sm:$0xff] %v1174_v51 }
 0x1dc   : > { %1303 = vst [vmem:[%s1937_s26 + $0x30] sm:$0xff] %v1169_v53  ;;  %v1613_v54 = vpop.f32.mrb[8].mxu1 }
 0x1dd   : > { %v1184_v55 = vadd.f32 %v1613_v54, %v1932_v35  ;;  %v1178_v56 = vpop.f32.mrb[9].mxu1 }
 0x1de   : > { %v1179_v57 = vadd.f32 %v1932_v35, %v1178_v56 }
 0x1df   : > { %1306 = vst [vmem:[%s1937_s26 + $0x48] sm:$0xff] %v1184_v55 }
 0x1e0   : > { %1305 = vst [vmem:[%s1937_s26 + $0x40] sm:$0xff] %v1179_v57  ;;  %v1616_v58 = vpop.f32.mrb[10].mxu1 }
 0x1e1   : > { %v1194_v59 = vadd.f32 %v1616_v58, %v1932_v35  ;;  %v1188_v60 = vpop.f32.mrb[11].mxu1 }
 0x1e2   : > { %v1189_v11 = vadd.f32 %v1932_v35, %v1188_v60 }
 0x1e3   : > { %1308 = vst [vmem:[%s1937_s26 + $0x58] sm:$0xff] %v1194_v59 }
 0x1e4   : > { %1307 = vst [vmem:[%s1937_s26 + $0x50] sm:$0xff] %v1189_v11  ;;  %v1619_v61 = vpop.f32.mrb[12].mxu1 }
 0x1e5   : > { %v1204_v62 = vadd.f32 %v1619_v61, %v1932_v35  ;;  %v1198_v63 = vpop.f32.mrb[13].mxu1 }
 0x1e6   : > { %v1199_v0 = vadd.f32 %v1932_v35, %v1198_v63 }
 0x1e7   : > { %1310 = vst [vmem:[%s1937_s26 + $0x68] sm:$0xff] %v1204_v62 }
 0x1e8   : > { %1309 = vst [vmem:[%s1937_s26 + $0x60] sm:$0xff] %v1199_v0  ;;  %v1622_v1 = vpop.f32.mrb[14].mxu1 }
 0x1e9   : > { %v1214_v2 = vadd.f32 %v1622_v1, %v1932_v35  ;;  %v1208_v3 = vpop.f32.mrb[15].mxu1 }
 0x1ea   : > { %v1209_v4 = vadd.f32 %v1932_v35, %v1208_v3 }
 0x1eb   : > { %1312 = vst [vmem:[%s1937_s26 + $0x78] sm:$0xff] %v1214_v2 }
 0x1ec   : > { %1311 = vst [vmem:[%s1937_s26 + $0x70] sm:$0xff] %v1209_v4  ;;  %v1625_v5 = vpop.f32.mrb[16].mxu1 }
 0x1ed   : > { %v1224_v6 = vadd.f32 %v1625_v5, %v1932_v35  ;;  %v1218_v7 = vpop.f32.mrb[17].mxu1 }
 0x1ee   : > { %v1219_v8 = vadd.f32 %v1932_v35, %v1218_v7 }
 0x1ef   : > { %1314 = vst [vmem:[%s1937_s26 + $0x88] sm:$0xff] %v1224_v6 }
 0x1f0   : > { %1313 = vst [vmem:[%s1937_s26 + $0x80] sm:$0xff] %v1219_v8  ;;  %v1628_v9 = vpop.f32.mrb[18].mxu1 }
 0x1f1   : > { %v1234_v10 = vadd.f32 %v1628_v9, %v1932_v35  ;;  %v1228_v13 = vpop.f32.mrb[19].mxu1 }
 0x1f2   : > { %v1229_v15 = vadd.f32 %v1932_v35, %v1228_v13 }
 0x1f3   : > { %1316 = vst [vmem:[%s1937_s26 + $0x98] sm:$0xff] %v1234_v10 }
 0x1f4   : > { %1315 = vst [vmem:[%s1937_s26 + $0x90] sm:$0xff] %v1229_v15  ;;  %v1631_v16 = vpop.f32.mrb[20].mxu1 }
 0x1f5   : > { %v1244_v17 = vadd.f32 %v1631_v16, %v1932_v35  ;;  %v1238_v18 = vpop.f32.mrb[21].mxu1 }
 0x1f6   : > { %v1239_v20 = vadd.f32 %v1932_v35, %v1238_v18 }
 0x1f7   : > { %1318 = vst [vmem:[%s1937_s26 + $0xa8] sm:$0xff] %v1244_v17 }
 0x1f8   : > { %1317 = vst [vmem:[%s1937_s26 + $0xa0] sm:$0xff] %v1239_v20  ;;  %v1634_v21 = vpop.f32.mrb[22].mxu1 }
 0x1f9   : > { %v1254_v22 = vadd.f32 %v1634_v21, %v1932_v35  ;;  %v1248_v14 = vpop.f32.mrb[23].mxu1 }
 0x1fa   : > { %v1249_v23 = vadd.f32 %v1932_v35, %v1248_v14 }
 0x1fb   : > { %1320 = vst [vmem:[%s1937_s26 + $0xb8] sm:$0xff] %v1254_v22 }
 0x1fc   : > { %1319 = vst [vmem:[%s1937_s26 + $0xb0] sm:$0xff] %v1249_v23  ;;  %v1637_v24 = vpop.f32.mrb[24].mxu1 }
 0x1fd   : > { %v1264_v25 = vadd.f32 %v1637_v24, %v1932_v35  ;;  %v1258_v26 = vpop.f32.mrb[25].mxu1 }
 0x1fe   : > { %v1259_v27 = vadd.f32 %v1932_v35, %v1258_v26 }
 0x1ff   : > { %1322 = vst [vmem:[%s1937_s26 + $0xc8] sm:$0xff] %v1264_v25 }
 0x200   : > { %1321 = vst [vmem:[%s1937_s26 + $0xc0] sm:$0xff] %v1259_v27  ;;  %v1640_v28 = vpop.f32.mrb[26].mxu1 }
 0x201   : > { %v1274_v12 = vadd.f32 %v1640_v28, %v1932_v35  ;;  %v1268_v29 = vpop.f32.mrb[27].mxu1 }
 0x202   : > { %v1269_v19 = vadd.f32 %v1932_v35, %v1268_v29 }
 0x203   : > { %1324 = vst [vmem:[%s1937_s26 + $0xd8] sm:$0xff] %v1274_v12 }
 0x204   : > { %1323 = vst [vmem:[%s1937_s26 + $0xd0] sm:$0xff] %v1269_v19  ;;  %v1643_v30 = vpop.f32.mrb[28].mxu1 }
 0x205   : > { %v1284_v31 = vadd.f32 %v1643_v30, %v1932_v35  ;;  %v1278_v32 = vpop.f32.mrb[29].mxu1 }
 0x206   : > { %v1279_v33 = vadd.f32 %v1932_v35, %v1278_v32 }
 0x207   : > { %1326 = vst [vmem:[%s1937_s26 + $0xe8] sm:$0xff] %v1284_v31 }
 0x208   : > { %1325 = vst [vmem:[%s1937_s26 + $0xe0] sm:$0xff] %v1279_v33  ;;  %v1646_v34 = vpop.f32.mrb[30].mxu1 }
 0x209   : > { %v1294_v36 = vadd.f32 %v1646_v34, %v1932_v35  ;;  %v1288_v37 = vpop.f32.mrb[31].mxu1 }
 0x20a   : > { %v1289_v38 = vadd.f32 %v1932_v35, %v1288_v37 }
 0x20b   : > { %1328 = vst [vmem:[%s1937_s26 + $0xf8] sm:$0xff] %v1294_v36 }
 0x20c   : > { %1327 = vst [vmem:[%s1937_s26 + $0xf0] sm:$0xff] %v1289_v38 }
 0x20d PF: > { %s15_s18 = sadd.s32 1, %s1680_s18  }
 0x20e   : > { %p12_p5 = scmp.ge.s32.totalorder %s15_s18, 4  }
 0x210   :  { %14 = sbr.rel (!%p12_p5) target bundleno = 1 (0x1), region = 70 }

</bundles_post_ra>
